<compile_context>
chip_gen: v7x
topology: tpu7x:2x2x1
jax: 0.10.0
libtpu: 0.0.40
codegen_flags: <defaults>
</compile_context>

<pallas_src>
import functools
import math

import jax
import jax.numpy as jnp
from jax.experimental import pallas as pl
from jax.experimental.pallas import tpu as pltpu

_NEG_LOG_1E4 = -math.log(1e-4)  # 9.21034...


def _cdiv(a, b):
    return (a + b - 1) // b


def _round_up(a, b):
    return _cdiv(a, b) * b


def _has_native_bf16_vpu():
    """True on TPU generations with a native bf16 VALU path (v6e / v7x)."""
    try:
        kind = jax.devices()[0].device_kind.lower()
    except Exception:
        return False
    return any(tag in kind for tag in ("v6", "v7", "7x"))


def sce_kernel(n_ref, pred_ref, labels_ref, out_ref, *, alpha, beta, tile_n, upcast):
    pid = pl.program_id(0)
    n = n_ref[0]                                  # batch size from SMEM (scalar prefetch)

    pred = pred_ref[...]                          # (C, T), input dtype
    if upcast:                                    # pre-v6e: no bf16 VPU, go f32 up front
        pred = pred.astype(jnp.float32)
    labels = labels_ref[...]                      # (1, T) int32
    c = pred.shape[0]

    # valid-sample mask (handles the ragged/unpadded last tile)
    col = pid * tile_n + jax.lax.broadcasted_iota(jnp.int32, (1, tile_n), 1)
    valid = col < n                               # (1, T) bool

    # true-class probability per sample: one-hot select + sublane reduce
    class_ids = jax.lax.broadcasted_iota(jnp.int32, (c, tile_n), 0)
    onehot = class_ids == labels                  # (C, T) via broadcast
    zero_p = jnp.zeros((), pred.dtype)
    p_true = jnp.sum(jnp.where(onehot, pred, zero_p),
                     axis=0, keepdims=True).astype(jnp.float32)   # (1, T) f32

    # --- CE branch: log on N values only (EUP work cut by a factor of C) ---
    ce_per = -jnp.log(p_true + jnp.float32(1e-8))                 # (1, T)

    # --- RCE branch, closed form (shares the one-hot selection with CE) ---
    pred_c = jnp.clip(pred, jnp.asarray(1e-7, pred.dtype), jnp.asarray(1.0, pred.dtype))
    row_sum = jnp.sum(pred_c.astype(jnp.float32), axis=0, keepdims=True)   # f32 accumulate
    p_true_c = jnp.clip(p_true, jnp.float32(1e-7), jnp.float32(1.0))
    rce_per = jnp.float32(_NEG_LOG_1E4) * (row_sum - p_true_c)             # (1, T)

    # fused weighted sum -> single masked reduction (select, NOT multiply,
    # so NaNs from the garbage tail of a partial block cannot propagate)
    per = jnp.float32(alpha) * ce_per + jnp.float32(beta) * rce_per
    partial = jnp.sum(jnp.where(valid, per, jnp.float32(0.0)))

    # per-tile partial into lane 0 of this tile's (1, 128) output block
    lane = jax.lax.broadcasted_iota(jnp.int32, (1, 128), 1)
    out_ref[...] = jnp.where(lane == 0, partial, jnp.float32(0.0))


def sce_loss(pred, labels, *, alpha, beta, num_classes,
             max_tile_n=32768, pred_is_transposed=False):
    if pred_is_transposed:
        c, n = pred.shape                 # lane-dense producer layout: zero extra passes
        pred_t = pred
    else:
        n, c = pred.shape
        # Single relayout to the lane-dense (C, N) compute layout.
        # TODO(synk): emit pred as (C, N) upstream and call with pred_is_transposed=True.
        pred_t = pred.T
    assert c == num_classes

    labels2d = labels.astype(jnp.int32).reshape(1, n)

    # Tile sizing: multiples of 128 lanes; no wrapper-side padding (partial
    # edge blocks are masked in-kernel).
    max_tile_n = max(128, (max_tile_n // 128) * 128)
    n128 = _round_up(n, 128)
    tile_n = min(max_tile_n, n128)
    # Once N is big, keep >= 8 grid steps so the "parallel" axis can feed both
    # TensorCores on v7x (and keeps the pipeline busy elsewhere).
    if n128 > 8 * 2048:
        tile_n = min(tile_n, max(2048, _round_up(_cdiv(n128, 8), 128)))
    grid_n = _cdiv(n, tile_n)

    upcast = (pred_t.dtype != jnp.float32) and not _has_native_bf16_vpu()

    kernel = functools.partial(
        sce_kernel, alpha=float(alpha), beta=float(beta),
        tile_n=tile_n, upcast=upcast)

    n_arr = jnp.asarray([n], dtype=jnp.int32)   # scalar prefetch -> SMEM

    partials = pl.pallas_call(
        kernel,
        out_shape=jax.ShapeDtypeStruct((1, grid_n * 128), jnp.float32),
        grid_spec=pltpu.PrefetchScalarGridSpec(
            num_scalar_prefetch=1,
            grid=(grid_n,),
            in_specs=[
                pl.BlockSpec((num_classes, tile_n), lambda i, n_ref: (0, i)),  # pred (C, T)
                pl.BlockSpec((1, tile_n), lambda i, n_ref: (0, i)),            # labels (1, T)
            ],
            out_specs=pl.BlockSpec((1, 128), lambda i, n_ref: (0, i)),
        ),
        compiler_params=pltpu.CompilerParams(
            dimension_semantics=("parallel",),   # independent tiles -> megacore-shardable
            vmem_limit_bytes=32 * 1024 * 1024,   # explicit; v5e scoped default is only 16 MiB
        ),
    )(n_arr, pred_t, labels2d)

    # mean hoisted: single scalar multiply by 1/N after summing per-tile partials
    return jnp.sum(partials) * jnp.float32(1.0 / n)


def sce_loss_ref(pred, labels, *, alpha, beta, num_classes):
    """Pure-JAX reference mirroring the PyTorch module."""
    pred = pred.astype(jnp.float32)
    log_pred = jnp.log(pred + 1e-8)
    ce = jnp.mean(-jnp.take_along_axis(log_pred, labels[:, None], axis=1)[:, 0])
    pred_c = jnp.clip(pred, 1e-7, 1.0)
    oh = jnp.clip(jax.nn.one_hot(labels, num_classes, dtype=jnp.float32), 1e-4, 1.0)
    rce = -jnp.sum(pred_c * jnp.log(oh), axis=1)
    return alpha * ce + beta * jnp.mean(rce)


if __name__ == "__main__":
    ALPHA, BETA, NUM_CLASSES = 0.1, 1.0, 10

    key = jax.random.PRNGKey(0)
    k1, k2, k3, k4 = jax.random.split(key, 4)

    # --- test 1: tiny batch (single partial tile), f32 probabilities --------
    N1 = 8
    pred1 = jax.nn.softmax(jax.random.normal(k1, (N1, NUM_CLASSES), jnp.float32), -1)
    labels1 = jax.random.randint(k2, (N1,), 0, NUM_CLASSES, dtype=jnp.int32)
    out1 = jax.block_until_ready(
        sce_loss(pred1, labels1, alpha=ALPHA, beta=BETA, num_classes=NUM_CLASSES))
    ref1 = sce_loss_ref(pred1, labels1, alpha=ALPHA, beta=BETA, num_classes=NUM_CLASSES)
    assert jnp.allclose(out1, ref1, rtol=1e-5, atol=1e-4), (out1, ref1)

    # --- test 2: multi-tile grid, ragged unpadded last tile, bf16 input -----
    N2 = 1000
    pred2 = jax.nn.softmax(jax.random.normal(k3, (N2, NUM_CLASSES), jnp.float32), -1)
    pred2_bf16 = pred2.astype(jnp.bfloat16)
    labels2 = jax.random.randint(k4, (N2,), 0, NUM_CLASSES, dtype=jnp.int32)
    out2 = jax.block_until_ready(
        sce_loss(pred2_bf16, labels2, alpha=ALPHA, beta=BETA,
                 num_classes=NUM_CLASSES, max_tile_n=256))
    ref2 = sce_loss_ref(pred2_bf16.astype(jnp.float32), labels2,
                        alpha=ALPHA, beta=BETA, num_classes=NUM_CLASSES)
    assert jnp.allclose(out2, ref2, rtol=1e-5, atol=1e-4), (out2, ref2)

    # --- test 3: lane-dense producer layout (no wrapper relayout at all) ----
    out3 = jax.block_until_ready(
        sce_loss(pred1.T, labels1, alpha=ALPHA, beta=BETA,
                 num_classes=NUM_CLASSES, pred_is_transposed=True))
    assert jnp.allclose(out3, ref1, rtol=1e-5, atol=1e-4), (out3, ref1)

    print("KERNEL_OK")
</pallas_src>

<mosaic_0001>
module attributes {stable_mosaic.version = 11 : i64} {
  func.func @sce_kernel(%arg0: i32, %arg1: memref<1xi32, #tpu.memory_space<smem>>, %arg2: memref<10x128xf32, #tpu.memory_space<vmem>>, %arg3: memref<1x128xi32, #tpu.memory_space<vmem>>, %arg4: memref<1x128xf32, #tpu.memory_space<vmem>>) attributes {dimension_semantics = [#tpu.dimension_semantics<parallel>], iteration_bounds = array<i64: 1>, scalar_prefetch = 1 : i64, scratch_operands = 0 : i64, tpu.core_type = #tpu.core_type<tc>, window_params = [{transform_indices = @transform_0, window_bounds = array<i64: 10, 128>}, {transform_indices = @transform_1, window_bounds = array<i64: 1, 128>}, {transform_indices = @transform_2, window_bounds = array<i64: 1, 128>}]} {
    %c0 = arith.constant 0 : index
    %0 = memref.load %arg1[%c0] : memref<1xi32, #tpu.memory_space<smem>>
    %c0_0 = arith.constant 0 : index
    %c0_1 = arith.constant 0 : index
    %1 = vector.load %arg2[%c0_0, %c0_1] : memref<10x128xf32, #tpu.memory_space<vmem>>, vector<10x128xf32>
    %c0_2 = arith.constant 0 : index
    %c0_3 = arith.constant 0 : index
    %2 = vector.load %arg3[%c0_2, %c0_3] : memref<1x128xi32, #tpu.memory_space<vmem>>, vector<1x128xi32>
    %c128_i32 = arith.constant 128 : i32
    %3 = arith.muli %arg0, %c128_i32 : i32
    %4 = tpu.iota {dimensions = array<i32: 1>} : vector<1x128xi32>
    %5 = vector.broadcast %3 : i32 to vector<1x128xi32>
    %6 = arith.addi %5, %4 : vector<1x128xi32>
    %7 = vector.broadcast %0 : i32 to vector<1x128xi32>
    %8 = arith.cmpi slt, %6, %7 : vector<1x128xi32>
    %9 = tpu.iota {dimensions = array<i32: 0>} : vector<10x128xi32>
    %10 = vector.broadcast %2 : vector<1x128xi32> to vector<10x128xi32>
    %11 = arith.cmpi eq, %9, %10 : vector<10x128xi32>
    %cst = arith.constant 0.000000e+00 : f32
    %12 = vector.broadcast %cst : f32 to vector<10x128xf32>
    %13 = arith.select %11, %1, %12 : vector<10x128xi1>, vector<10x128xf32>
    %cst_4 = arith.constant dense<0.000000e+00> : vector<128xf32>
    %14 = vector.multi_reduction <add>, %13, %cst_4 [0] : vector<10x128xf32> to vector<128xf32>
    %15 = vector.shape_cast %14 : vector<128xf32> to vector<1x128xf32>
    %cst_5 = arith.constant 9.99999993E-9 : f32
    %16 = vector.broadcast %cst_5 : f32 to vector<1x128xf32>
    %17 = arith.addf %15, %16 : vector<1x128xf32>
    %18 = math.log %17 : vector<1x128xf32>
    %cst_6 = arith.constant 0.000000e+00 : f32
    %19 = vector.broadcast %cst_6 : f32 to vector<1x128xf32>
    %20 = arith.subf %19, %18 : vector<1x128xf32>
    %cst_7 = arith.constant 1.000000e-07 : f32
    %cst_8 = arith.constant 1.000000e+00 : f32
    %21 = vector.broadcast %cst_7 : f32 to vector<10x128xf32>
    %22 = arith.maximumf %21, %1 : vector<10x128xf32>
    %23 = vector.broadcast %cst_8 : f32 to vector<10x128xf32>
    %24 = arith.minimumf %23, %22 : vector<10x128xf32>
    %cst_9 = arith.constant dense<0.000000e+00> : vector<128xf32>
    %25 = vector.multi_reduction <add>, %24, %cst_9 [0] : vector<10x128xf32> to vector<128xf32>
    %26 = vector.shape_cast %25 : vector<128xf32> to vector<1x128xf32>
    %cst_10 = arith.constant 1.000000e-07 : f32
    %cst_11 = arith.constant 1.000000e+00 : f32
    %27 = vector.broadcast %cst_10 : f32 to vector<1x128xf32>
    %28 = arith.maximumf %27, %15 : vector<1x128xf32>
    %29 = vector.broadcast %cst_11 : f32 to vector<1x128xf32>
    %30 = arith.minimumf %29, %28 : vector<1x128xf32>
    %31 = arith.subf %26, %30 : vector<1x128xf32>
    %cst_12 = arith.constant 9.21034049 : f32
    %32 = vector.broadcast %cst_12 : f32 to vector<1x128xf32>
    %33 = arith.mulf %32, %31 : vector<1x128xf32>
    %cst_13 = arith.constant 1.000000e-01 : f32
    %34 = vector.broadcast %cst_13 : f32 to vector<1x128xf32>
    %35 = arith.mulf %34, %20 : vector<1x128xf32>
    %cst_14 = arith.constant 1.000000e+00 : f32
    %36 = vector.broadcast %cst_14 : f32 to vector<1x128xf32>
    %37 = arith.mulf %36, %33 : vector<1x128xf32>
    %38 = arith.addf %35, %37 : vector<1x128xf32>
    %cst_15 = arith.constant 0.000000e+00 : f32
    %39 = vector.broadcast %cst_15 : f32 to vector<1x128xf32>
    %40 = arith.select %8, %38, %39 : vector<1x128xi1>, vector<1x128xf32>
    %41 = vector.shape_cast %40 : vector<1x128xf32> to vector<1x1x128xf32>
    %cst_16 = arith.constant dense<0.000000e+00> : vector<1xf32>
    %42 = vector.multi_reduction <add>, %41, %cst_16 [1, 2] : vector<1x1x128xf32> to vector<1xf32>
    %43 = vector.shape_cast %42 : vector<1xf32> to vector<1x1x1xf32>
    %44 = vector.extract %43[0, 0, 0] : f32 from vector<1x1x1xf32>
    %45 = tpu.iota {dimensions = array<i32: 1>} : vector<1x128xi32>
    %c0_i32 = arith.constant 0 : i32
    %46 = vector.broadcast %c0_i32 : i32 to vector<1x128xi32>
    %47 = arith.cmpi eq, %45, %46 : vector<1x128xi32>
    %cst_17 = arith.constant 0.000000e+00 : f32
    %48 = vector.broadcast %44 : f32 to vector<1x128xf32>
    %49 = vector.broadcast %cst_17 : f32 to vector<1x128xf32>
    %50 = arith.select %47, %48, %49 : vector<1x128xi1>, vector<1x128xf32>
    %c0_18 = arith.constant 0 : index
    %c0_19 = arith.constant 0 : index
    %51 = vector.load %arg4[%c0_18, %c0_19] : memref<1x128xf32, #tpu.memory_space<vmem>>, vector<1x128xf32>
    tpu.vector_store %arg4[%c0_18, %c0_19], %50 {strides = array<i32>} : memref<1x128xf32, #tpu.memory_space<vmem>>, vector<1x128xf32>,
    return
  }
  func.func @transform_0(%arg0: i32, %arg1: memref<1xi32, #tpu.memory_space<smem>>) -> (i32, i32) {
    %c0_i32 = arith.constant 0 : i32
    %c0_i32_0 = arith.constant 0 : i32
    return %c0_i32, %arg0 : i32, i32
  }
  func.func @transform_1(%arg0: i32, %arg1: memref<1xi32, #tpu.memory_space<smem>>) -> (i32, i32) {
    %c0_i32 = arith.constant 0 : i32
    %c0_i32_0 = arith.constant 0 : i32
    return %c0_i32, %arg0 : i32, i32
  }
  func.func @transform_2(%arg0: i32, %arg1: memref<1xi32, #tpu.memory_space<smem>>) -> (i32, i32) {
    %c0_i32 = arith.constant 0 : i32
    %c0_i32_0 = arith.constant 0 : i32
    return %c0_i32, %arg0 : i32, i32
  }
}

</mosaic_0001>

<bundles_post_ra>
// kernel: tpu_custom_call.1
= control target key start
LH: loop header
LB: loop body
LE: loop exit
PB: predicated region body
PF: predicated region fallthrough
CT: control target
= control target key end

     0   :  { %v19_v2 = vlaneseq  ;;  %s172_s0 = inlined_call_operand.<no memory space> [shape: s32[1], index: 0, kind: input, shape index: {}]   ;;  %s173_s1 = inlined_call_operand.vmem [shape: f32[10,8], index: 1, kind: input, shape index: {}]   ;;  %s174_s2 = inlined_call_operand.vmem [shape: s32[1,8], index: 2, kind: input, shape index: {}]   ;;  %s175_s3 = inlined_call_operand.hbm [shape: f32[1,128], index: 3, kind: output, shape index: {}]  }
   0x1   :  { %v15_v0 = vld [vmem:[%s173_s1] sm:$0xff]  ;;  %v16_v1 = vld [vmem:[%s173_s1 + $0x8] sm:$0x3] }
   0x2   :  { %v97_v3 = vld [vmem:[%s174_s2] ss:$0 sm:$0xff]  ;;  %v49_v4 = vmax.f32 %v15_v0, 1e-07  ;;  %v50_v5 = vmax.f32 %v16_v1, 1e-07 }
   0x3   :  { %v26_v6 = vshrl.u32 %v19_v2, 7 }
   0x4   :  { %9 = vsyncpa [#allocation5], 0  ;;  %v51_v7 = vmin.f32 %v49_v4, 1.0  ;;  %v52_v8 = vmin.f32 %v50_v5, 1.0  ;;  %vm36_vm1 = vcmask 1041408   ;;  %v20_v34 = vand.u32 127, %v19_v2 }
   0x5   :  { %v27_v9 = vadd.s32 8, %v26_v6  ;;  %vm32_vm0 = vcmp.eq.s32.totalorder %v26_v6, %v97_v3  ;;  %v23_v35 = vstv %s172_s0  ;;  %vm68_vm4 = vcmask 1040384   ;;  %s127_s18 = smov [#allocation4]  }
   0x6   :  { %v53_v10 = vsel %vm36_vm1, %v52_v8, 0.0  ;;  %v34_v11 = vsel %vm32_vm0, %v15_v0, 0.0  ;;  %vm24_vm3 = vcmp.lt.s32.totalorder %v20_v34, %v23_v35  ;;  %s89_s19 = sshll.u32 %s127_s18, 4  ;;  %vm79_vm5 = vcmp.eq.s32.totalorder %v20_v34, 0  ;;  %s90_s19 = int_to_ptr.vmem [resolvable:$true] %s89_s19 }
   0x7   :  { %vm33_vm2 = vcmp.eq.s32.totalorder %v27_v9, %v97_v3  ;;  %v54_v12 = vadd.f32 %v53_v10, %v51_v7  ;;  %s103_s20 = scalar_lea.vmem %s90_s19, 16  ;;  %s107_s21 = scalar_lea.vmem %s90_s19, 32 }
   0x8   :  { %v35_v13 = vsel %vm33_vm2, %v16_v1, 0.0  ;;  %p104_p0 = scmp.ne.s32.totalorder %s90_s19, %s103_s20  ;;  %p108_p1 = scmp.lt.s32.totalorder %s90_s19, %s90_s19 }
   0x9   :  { %v37_v14 = vsel %vm36_vm1, %v35_v13, 0.0  ;;  %v55_v16 = vrot.slane %v54_v12, 4  ;;  %p109_p2 = scmp.lt.s32.totalorder %s107_s21, %s103_s20 }
   0xa   :  { %v38_v15 = vadd.f32 %v37_v14, %v34_v11 }
   0xb   :  { %v56_v19 = vadd.f32 %v55_v16, %v54_v12  ;;  %p110_p3 = por %p109_p2, %p108_p1 }
   0xc   :  { %v39_v17 = vrot.slane %v38_v15, 4 }
   0xd   :  { %v57_v22 = vrot.slane %v56_v19, 2  ;;  %p111_p4 = pnand %p110_p3, %p104_p0 }
   0xe   :  { %v40_v18 = vadd.f32 %v39_v17, %v38_v15 }
   0xf   :  { %v58_v25 = vadd.f32 %v57_v22, %v56_v19 }
  0x10   :  { %v41_v20 = vrot.slane %v40_v18, 2 }
  0x11   :  { %v59_v27 = vrot.slane %v58_v25, 1 }
  0x12   :  { %v42_v21 = vadd.f32 %v41_v20, %v40_v18 }
  0x13   :  { %v60_v29 = vadd.f32 %v59_v27, %v58_v25 }
  0x14   :  { %v43_v23 = vrot.slane %v42_v21, 1 }
  0x16   :  { %v44_v24 = vadd.f32 %v43_v23, %v42_v21 }
  0x18   :  { %v45_v26 = vadd.f32 1e-08, %v44_v24  ;;  %v61_v28 = vmax.f32 %v44_v24, 1e-07 }
  0x1a   :  { %101 = vlog2.f32 %v45_v26  ;;  %v62_v30 = vmin.f32 %v61_v28, 1.0 }
  0x1c   :  { %v63_v31 = vsub.f32 %v60_v29, %v62_v30 }
  0x1e   :  { %v64_v37 = vmul.f32 9.2103405, %v63_v31 }
  0x24   :  { %v102_v32 = vpop.eup %101 }
  0x25   :  { %v47_v33 = vmul.f32 0.6931472, %v102_v32 }
  0x27   :  { %v48_v36 = vsub.f32 0.0, %v47_v33 }
  0x29   :  { %v65_v38 = vmul.f32 0.1, %v48_v36 }
  0x2b   :  { %v66_v39 = vadd.f32 %v65_v38, %v64_v37 }
  0x2d   :  { %v67_v40 = vsel %vm24_vm3, %v66_v39, 0.0 }
  0x2e   :  { %v69_v41 = vsel %vm68_vm4, %v67_v40, 0.0 }
  0x2f   :  { %70 = vadd.xlane.f32.xlu0 %v69_v41 }
  0xbc   :  { %v71_v42 = vpop.xlane.xlu0 %70 }
  0xbd   :  { %v72_v43 = vrot.slane %v71_v42, 4 }
  0xbf   :  { %v73_v44 = vadd.f32 %v72_v43, %v71_v42 }
  0xc1   :  { %v74_v45 = vrot.slane %v73_v44, 2 }
  0xc3   :  { %v75_v46 = vadd.f32 %v74_v45, %v73_v44 }
  0xc5   :  { %v76_v47 = vrot.slane %v75_v46, 1 }
  0xc7   :  { %v77_v48 = vadd.f32 %v76_v47, %v75_v46 }
  0xc9   :  { %98 = vpush %v77_v48 }
  0xfa   :  { %s99_s0 = spop %98 }
  0xfb   :  { %v80_v49 = vstv %s99_s0 }
  0xfc   :  { %v81_v50 = vsel %vm79_vm5, %v80_v49, 0.0 }
  0xfd   :  { %82 = vst [vmem:[#allocation4] sm:$0x1] %v81_v50 }
  0xfe   :  { %114 = shalt.err (!%p111_p4)
}
  0xff   :  { %s115_s24 = scalar_lea.hbm %s175_s3, 16 }
 0x100   :  { %p116_p5 = scmp.ne.s32.totalorder %s175_s3, %s115_s24  ;;  %p119_p6 = scmp.lt.u32.totalorder %s115_s24, %s175_s3 }
 0x102   :  { %p121_p7 = pnand %p119_p6, %p116_p5 }
 0x104   :  { %124 = shalt.err (!%p121_p7)
}
 0x105   :  { %92 = dma.vmem_to_hbm [thread:$0]  %s90_s19, 16, %s175_s3, [#allocation5]  }
 0x106   :  { %125 = dma.done.wait [#allocation5], 16  }
 0x107   :  { %126 = vsyncadd [#allocation5], 4294967280 }
 0x108   :  { %96 = vsyncpa [#allocation5], 1 }

</bundles_post_ra>
